<compile_context>
chip_gen: v6e
topology: v6e:2x2x1
jax: 0.10.0
libtpu: 0.0.40
codegen_flags: <defaults>
</compile_context>

<pallas_src>
import jax
import jax.numpy as jnp
from jax.experimental import pallas as pl
from jax.experimental.pallas import tpu as pltpu


def _round_up(x, m):
    return ((x + m - 1) // m) * m


def _value_kernel(state_ref, p_ref, out_ref):
    # state_ref: (TB, D) tile in VMEM (native dtype)
    # p_ref:     (D, D)  f32 tile in VMEM (resident across all grid steps)
    # out_ref:   (1, TB) f32 tile in VMEM (lane-dense output slab)
    s = state_ref[...].astype(jnp.float32)          # matches .to(torch.float32)
    p = p_ref[...].astype(jnp.float32)
    # MXU matmul (s @ P), then VPU elementwise mul + row reduce on the XLU.
    sp = jnp.dot(s, p, preferred_element_type=jnp.float32)     # (TB, D)
    v = jnp.sum(sp * s, axis=-1)                                # (TB,)
    out_ref[...] = v.reshape(1, -1)                             # lane-dense store


def value_network_forward(state, P, *, tile_b=1024):
    """state: (B, D) array (any float dtype), P: (D, D) float32.
    Returns (B, 1) float32 = s^T P s per batch row."""
    B, D = state.shape

    # Batch tile: large (1024) when there is enough batch to pipeline, otherwise
    # the whole (sublane-padded) batch in a single tile.
    if B > tile_b:
        TB = tile_b                       # multiple of 128 -> lane-dense out block
    else:
        TB = _round_up(max(B, 1), 8)      # sublane-aligned single tile

    num_tiles = pl.cdiv(B, TB)
    B_pad = num_tiles * TB
    if B_pad != B:
        # Zero rows contribute 0 to the quadratic form; sliced off below.
        state = jnp.pad(state, ((0, B_pad - B), (0, 0)))

    out = pl.pallas_call(
        _value_kernel,
        out_shape=jax.ShapeDtypeStruct((1, B_pad), jnp.float32),
        grid_spec=pltpu.PrefetchScalarGridSpec(
            num_scalar_prefetch=0,
            grid=(num_tiles,),
            in_specs=[
                # state: tiled along batch -> double-buffered by the pipeline.
                pl.BlockSpec((TB, D), lambda i: (i, 0)),
                # P: block-invariant -> stays resident in VMEM across the grid.
                pl.BlockSpec((D, D), lambda i: (0, 0)),
            ],
            # Lane-dense output tiles along the 128-lane axis.
            out_specs=pl.BlockSpec((1, TB), lambda i: (0, i)),
        ),
        compiler_params=pltpu.CompilerParams(
            # Independent batch tiles: shard across v7x's 2 TensorCores.
            dimension_semantics=("parallel",),
        ),
    )(state, P)

    # Free layout plumbing back to the module's (B, 1) output.
    return out.reshape(B_pad, 1)[:B]


if __name__ == "__main__":
    key = jax.random.PRNGKey(0)
    B, state_dim = 8, 32

    # Deterministic parameter init: module initializes P = eye(state_dim).
    P = jnp.eye(state_dim, dtype=jnp.float32)

    state = jax.random.normal(key, (B, state_dim), dtype=jnp.float32)

    out = value_network_forward(state, P)
    out = jax.block_until_ready(out)

    # Reference check against plain-JAX einsum (same semantics as torch.einsum).
    ref = jnp.einsum("bi,ij,bj->b",
                     state.astype(jnp.float32), P, state.astype(jnp.float32))[:, None]
    assert out.shape == (B, 1)
    assert jnp.allclose(out, ref, rtol=1e-5, atol=1e-5)

    print("KERNEL_OK")
</pallas_src>

<mosaic_0001>
module attributes {stable_mosaic.version = 11 : i64} {
  func.func @_value_kernel(%arg0: i32, %arg1: memref<8x32xf32, #tpu.memory_space<vmem>>, %arg2: memref<32x32xf32, #tpu.memory_space<vmem>>, %arg3: memref<1x8xf32, #tpu.memory_space<vmem>>) attributes {dimension_semantics = [#tpu.dimension_semantics<parallel>], iteration_bounds = array<i64: 1>, scalar_prefetch = 0 : i64, scratch_operands = 0 : i64, tpu.core_type = #tpu.core_type<tc>, window_params = [{transform_indices = @transform_0, window_bounds = array<i64: 8, 32>}, {pipeline_mode = #tpu.pipeline_mode<synchronous>, transform_indices = @transform_1, window_bounds = array<i64: 32, 32>}, {transform_indices = @transform_2, window_bounds = array<i64: 1, 8>}]} {
    %c0 = arith.constant 0 : index
    %c0_0 = arith.constant 0 : index
    %0 = vector.load %arg1[%c0, %c0_0] : memref<8x32xf32, #tpu.memory_space<vmem>>, vector<8x32xf32>
    %c0_1 = arith.constant 0 : index
    %c0_2 = arith.constant 0 : index
    %1 = vector.load %arg2[%c0_1, %c0_2] : memref<32x32xf32, #tpu.memory_space<vmem>>, vector<32x32xf32>
    %cst = arith.constant dense<0.000000e+00> : vector<8x32xf32>
    %2 = tpu.matmul %0, %1, %cst {dimension_numbers = #tpu.dot_dimension_numbers<[1], [0], [0], [1], [0, 0, 1, 1], [], []>} : vector<8x32xf32>, vector<32x32xf32>, vector<8x32xf32> -> vector<8x32xf32>
    %3 = arith.mulf %2, %0 : vector<8x32xf32>
    %cst_3 = arith.constant dense<0.000000e+00> : vector<8xf32>
    %4 = vector.multi_reduction <add>, %3, %cst_3 [1] : vector<8x32xf32> to vector<8xf32>
    %5 = vector.shape_cast %4 : vector<8xf32> to vector<1x8xf32>
    %c0_4 = arith.constant 0 : index
    %c0_5 = arith.constant 0 : index
    %6 = vector.load %arg3[%c0_4, %c0_5] : memref<1x8xf32, #tpu.memory_space<vmem>>, vector<1x8xf32>
    tpu.vector_store %arg3[%c0_4, %c0_5], %5 {strides = array<i32>} : memref<1x8xf32, #tpu.memory_space<vmem>>, vector<1x8xf32>,
    return
  }
  func.func @transform_0(%arg0: i32) -> (i32, i32) {
    %c0_i32 = arith.constant 0 : i32
    %c0_i32_0 = arith.constant 0 : i32
    return %arg0, %c0_i32 : i32, i32
  }
  func.func @transform_1(%arg0: i32) -> (i32, i32) {
    %c0_i32 = arith.constant 0 : i32
    %c0_i32_0 = arith.constant 0 : i32
    %c0_i32_1 = arith.constant 0 : i32
    return %c0_i32, %c0_i32_0 : i32, i32
  }
  func.func @transform_2(%arg0: i32) -> (i32, i32) {
    %c0_i32 = arith.constant 0 : i32
    %c0_i32_0 = arith.constant 0 : i32
    return %c0_i32, %arg0 : i32, i32
  }
}

</mosaic_0001>

<bundles_post_ra>
// kernel: tpu_custom_call.1
= control target key start
LH: loop header
LB: loop body
LE: loop exit
PB: predicated region body
PF: predicated region fallthrough
CT: control target
= control target key end

     0   :  { %7 = vsyncpa [#allocation3], 0  ;;  %s268_s0 = inlined_call_operand.hbm [shape: f32[8,32], index: 0, kind: input, shape index: {}]   ;;  %s269_s1 = inlined_call_operand.hbm [shape: f32[32,32], index: 1, kind: input, shape index: {}]   ;;  %s270_s2 = inlined_call_operand.hbm [shape: f32[1,8], index: 2, kind: output, shape index: {}]  }
   0x1   :  { %8 = vsyncpa [#allocation6], 0 }
   0x2   :  { %9 = vsyncpa [#allocation4], 0  ;;  %s237_s9 = smov [#allocation2]   ;;  %s238_s11 = smov [#allocation5]  }
   0x3   :  { %s16_s10 = sshll.u32 %s237_s9, 4  ;;  %s25_s12 = sshll.u32 %s238_s11, 4  ;;  %s17_s10 = int_to_ptr.vmem [resolvable:$true] %s16_s10  ;;  %s26_s12 = int_to_ptr.vmem [resolvable:$true] %s25_s12 }
   0x4   :  { %s179_s13 = scalar_lea.vmem %s17_s10, 128  ;;  %p184_p1 = scmp.lt.s32.totalorder %s17_s10, %s17_s10 }
   0x5   :  { %p180_p0 = scmp.ne.s32.totalorder %s17_s10, %s179_s13  ;;  %p185_p2 = scmp.lt.s32.totalorder %s179_s13, %s179_s13 }
   0x7   :  { %p186_p3 = por %p185_p2, %p184_p1 }
   0x9   :  { %p187_p4 = pnand %p186_p3, %p180_p0 }
   0xb   :  { %190 = shalt.err (!%p187_p4)
}
   0xc   :  { %19 = dma.hbm_to_vmem [thread:$0]  %s268_s0, 128, %s17_s10, [#allocation3]  }
   0xd   :  { %s199_s16 = scalar_lea.vmem %s26_s12, 512  ;;  %p204_p6 = scmp.lt.s32.totalorder %s26_s12, %s26_s12 }
   0xe   :  { %p200_p5 = scmp.ne.s32.totalorder %s26_s12, %s199_s16  ;;  %p205_p7 = scmp.lt.s32.totalorder %s199_s16, %s199_s16 }
  0x10   :  { %p206_p8 = por %p205_p7, %p204_p6 }
  0x12   :  { %p207_p9 = pnand %p206_p8, %p200_p5 }
  0x14   :  { %210 = shalt.err (!%p207_p9)
}
  0x15   :  { %s239_s17 = smov 128   ;;  %s240_s18 = smov 8  }
  0x16   :  { %31 = dma.hbm_to_vmem [thread:$0]  %s269_s1, 512, %s26_s12, [#allocation6], %s239_s17, %s239_s17, %s240_s18  }
  0x17   :  { %231 = dma.done.wait [#allocation3], 128  }
  0x18   :  { %232 = vsyncadd [#allocation3], 4294967168 }
  0x19   :  { %233 = dma.done.wait [#allocation6], 512  }
  0x1a   :  { %234 = vsyncadd [#allocation6], 4294966784  ;;  %v241_v0 = vmov 0.0   ;;  %vm242_vm0 = vmmov 0   ;;  %v42_v1 = vld [vmem:[#allocation5 + $0x18] sm:$0xff]  ;;  %v41_v2 = vld [vmem:[#allocation5 + $0x10] sm:$0xff]  ;;  %v122_v10 = vlaneseq }
  0x1b   :  { %153 = vmatprep.subr.mxu0 %v241_v0  ;;  %161 = vmatprep.mubr.msk.f32.mxu0 %vm242_vm0, %v241_v0  ;;  %v40_v3 = vld [vmem:[#allocation5 + $0x8] sm:$0xff]  ;;  %v39_v4 = vld [vmem:[#allocation5] sm:$0xff]  ;;  %v38_v5 = vld [vmem:[#allocation2] sm:$0xff]  ;;  %vm43_vm1 = vcmask 261120   ;;  %s243_s0 = smov [#allocation7]   ;;  %vm129_vm2 = vcmask 57344  }
  0x1c   :  { %154 = vmatpush3.msra.mxu0 %v42_v1  ;;  %v123_v11 = vand.u32 127, %v122_v10  ;;  %v125_v12 = vshrl.u32 %v122_v10, 7  ;;  %s137_s1 = sshll.u32 %s243_s0, 4  ;;  %s138_s1 = int_to_ptr.vmem [resolvable:$true] %s137_s1 }
  0x1d   :  { %155 = vmatprep.subr.mxu0 %v241_v0  ;;  %s211_s21 = scalar_lea.vmem %s138_s1, 16  ;;  %s215_s22 = scalar_lea.vmem %s138_s1, 32 }
  0x1e   :  { %156 = vmatpush3.msra.mxu0 %v41_v2  ;;  %v126_v13 = vsub.s32 %v123_v11, %v125_v12  ;;  %p212_p10 = scmp.ne.s32.totalorder %s138_s1, %s211_s21  ;;  %p216_p11 = scmp.lt.s32.totalorder %s138_s1, %s138_s1 }
  0x1f   :  { %157 = vmatprep.subr.mxu0 %v241_v0  ;;  %p217_p12 = scmp.lt.s32.totalorder %s215_s22, %s211_s21 }
  0x20   :  { %158 = vmatpush3.msra.mxu0 %v40_v3 }
  0x21   :  { %159 = vmatprep.subr.mxu0 %v241_v0  ;;  %p218_p13 = por %p217_p12, %p216_p11 }
  0x22   :  { %160 = vmatpush3.msra.mxu0 %v39_v4 }
  0x23   :  { %162 = vmatmul.mubr.msk.f32.vlgmr.msra.gmra.mxu0 %vm43_vm1, %v38_v5  ;;  %p219_p0 = pnand %p218_p13, %p212_p10 }
  0xe3   :  { %v113_v6 = vpop.f32.mrf.mxu0 }
  0xe4   :  { %v117_v7 = vmul.f32 %v113_v6, %v38_v5 }
  0xe5   :  { %v163_v8 = vpop.f32.mrf.mxu0 }
  0xe6   :  { %v118_v9 = vsel %vm43_vm1, %v117_v7, 0.0 }
  0xe7   :  { %119 = vadd.xlane.f32.xlu0 %v118_v9 }
 0x170   :  { %v120_v14 = vpop.xlane.xlu0 %119 }
 0x171   :  { %v127_v15 = vrot.slane %v120_v14, %v126_v13 }
 0x173   :  { %130 = vst.msk [vmem:[#allocation7] sm:$0x1] %vm129_vm2, %v127_v15 }
 0x174   :  { %222 = shalt.err (!%p219_p0)
}
 0x175   :  { %140 = dma.vmem_to_hbm [thread:$0]  %s138_s1, 16, %s270_s2, [#allocation4]  }
 0x176   :  { %235 = dma.done.wait [#allocation4], 16  }
 0x177   :  { %236 = vsyncadd [#allocation4], 4294967280 }
 0x178   :  { %144 = vsyncpa [#allocation3], 1 }
 0x179   :  { %145 = vsyncpa [#allocation6], 1 }
 0x17a   :  { %146 = vsyncpa [#allocation4], 1 }

</bundles_post_ra>
